<compile_context>
chip_gen: v6e
topology: v6e:2x2x1
jax: 0.10.0
libtpu: 0.0.40
codegen_flags: <defaults>
</compile_context>

<pallas_src>
import jax
import jax.numpy as jnp
from jax.experimental import pallas as pl
from jax.experimental.pallas import tpu as pltpu


def _rmsnorm_kernel(x_ref, w_ref, o_ref):
    # x_ref: (TR, H) row tile; w_ref: (1, H) resident weight; o_ref: (TR, H).
    x = x_ref[...].astype(jnp.float32)
    w = w_ref[...].astype(jnp.float32)                 # broadcasts over rows
    ms = jnp.mean(x * x, axis=-1, keepdims=True)       # (TR, 1), XLU reduce
    # eps added AFTER sqrt to match the torch module exactly.
    inv = pl.reciprocal(jnp.sqrt(ms) + 1e-6, approx=True)   # (TR, 1), EUP vrcp
    o_ref[...] = ((x * inv) * w).astype(o_ref.dtype)   # two VPU muls / element


def _round_up(n, m):
    return ((n + m - 1) // m) * m


def _pick_tiling(dtype, H, R):
    """Choose (row_tile, vmem_limit_bytes) from the generation's VMEM size."""
    try:
        info = pltpu.get_tpu_info()
        vmem_cap = int(getattr(info, "vmem_capacity_bytes", 64 * 1024 * 1024))
        if vmem_cap <= 0:
            vmem_cap = 64 * 1024 * 1024
    except Exception:
        # Fall back to the most constrained generation (v7x: 64 MiB per TC).
        vmem_cap = 64 * 1024 * 1024

    # Scoped VMEM limit: ~75% of physical, never above 96 MiB
    # (v5e/v6e -> 96 MiB, v7x -> 48 MiB), leaving headroom for the compiler.
    vmem_limit = min(int(vmem_cap * 0.75), 96 * 1024 * 1024)

    itemsize = jnp.dtype(dtype).itemsize
    sub = 16 if itemsize < 4 else 8          # sublane packing multiple
    # Working set per row: double-buffered in + double-buffered out in the
    # native dtype, plus ~2 f32-tile-sized intermediates inside the body.
    bytes_per_row = H * (4 * itemsize + 8)
    row_tile = int(0.7 * vmem_limit) // max(bytes_per_row, 1)
    row_tile = max(sub, min(1024, (row_tile // sub) * sub))
    # Never use a tile (much) larger than the actual row count.
    row_tile = min(row_tile, _round_up(R, sub))
    return row_tile, vmem_limit


def rms_normal(x, w, *, row_tile=None):
    """x: (..., H) float array, w: (H,) weight. Returns same shape/dtype as x."""
    orig_shape = x.shape
    H = orig_shape[-1]
    assert w.shape == (H,)
    x2d = x.reshape(-1, H)
    R = x2d.shape[0]
    w2d = w.reshape(1, H)

    auto_tile, vmem_limit = _pick_tiling(x.dtype, H, R)
    if row_tile is None:
        row_tile = auto_tile

    grid = (pl.cdiv(R, row_tile),)   # partial last tile handled by Pallas

    out = pl.pallas_call(
        _rmsnorm_kernel,
        out_shape=jax.ShapeDtypeStruct((R, H), x.dtype),
        grid_spec=pltpu.PrefetchScalarGridSpec(
            num_scalar_prefetch=0,
            grid=grid,
            in_specs=[
                pl.BlockSpec((row_tile, H), lambda i: (i, 0)),  # x row tile
                pl.BlockSpec((1, H), lambda i: (0, 0)),         # weight (resident)
            ],
            out_specs=pl.BlockSpec((row_tile, H), lambda i: (i, 0)),
        ),
        compiler_params=pltpu.CompilerParams(
            dimension_semantics=("parallel",),   # shards grid across TCs on v7x
            vmem_limit_bytes=int(vmem_limit),
        ),
    )(x2d, w2d)
    return out.reshape(orig_shape)


def rms_normal_ref(x, w):
    # Pure-JAX reference with identical semantics to the PyTorch module.
    ms = jnp.mean(x.astype(jnp.float32) ** 2, axis=-1, keepdims=True)
    return (w * x / (jnp.sqrt(ms) + 1e-6)).astype(x.dtype)


if __name__ == "__main__":
    key = jax.random.PRNGKey(0)
    kx, kw = jax.random.split(key)

    batch, seq, hidden = 2, 8, 32
    x = jax.random.normal(kx, (batch, seq, hidden), dtype=jnp.float32)
    # Deterministic init of the module parameter (torch.randn(input_dim) analogue).
    w = jax.random.normal(kw, (hidden,), dtype=jnp.float32)

    out = rms_normal(x, w)
    jax.block_until_ready(out)

    ref = rms_normal_ref(x, w)
    assert out.shape == x.shape and out.dtype == x.dtype
    # Tolerance loosened for the EUP approximate reciprocal (~1e-3-level rel err).
    assert jnp.allclose(out, ref, atol=1e-3, rtol=1e-2), "mismatch vs reference"

    print("KERNEL_OK")
</pallas_src>

<mosaic_0001>
module attributes {stable_mosaic.version = 11 : i64} {
  func.func @_rmsnorm_kernel(%arg0: i32, %arg1: memref<16x32xf32, #tpu.memory_space<vmem>>, %arg2: memref<1x32xf32, #tpu.memory_space<vmem>>, %arg3: memref<16x32xf32, #tpu.memory_space<vmem>>) attributes {dimension_semantics = [#tpu.dimension_semantics<parallel>], iteration_bounds = array<i64: 1>, scalar_prefetch = 0 : i64, scratch_operands = 0 : i64, tpu.core_type = #tpu.core_type<tc>, window_params = [{transform_indices = @transform_0, window_bounds = array<i64: 16, 32>}, {pipeline_mode = #tpu.pipeline_mode<synchronous>, transform_indices = @transform_1, window_bounds = array<i64: 1, 32>}, {transform_indices = @transform_2, window_bounds = array<i64: 16, 32>}]} {
    %c0 = arith.constant 0 : index
    %c0_0 = arith.constant 0 : index
    %0 = vector.load %arg1[%c0, %c0_0] : memref<16x32xf32, #tpu.memory_space<vmem>>, vector<16x32xf32>
    %c0_1 = arith.constant 0 : index
    %c0_2 = arith.constant 0 : index
    %1 = vector.load %arg2[%c0_1, %c0_2] : memref<1x32xf32, #tpu.memory_space<vmem>>, vector<1x32xf32>
    %2 = arith.mulf %0, %0 : vector<16x32xf32>
    %cst = arith.constant dense<0.000000e+00> : vector<16xf32>
    %3 = vector.multi_reduction <add>, %2, %cst [1] : vector<16x32xf32> to vector<16xf32>
    %4 = vector.shape_cast %3 : vector<16xf32> to vector<16x1xf32>
    %cst_3 = arith.constant 3.200000e+01 : f32
    %5 = vector.broadcast %cst_3 : f32 to vector<16x1xf32>
    %6 = arith.divf %4, %5 : vector<16x1xf32>
    %7 = math.sqrt %6 : vector<16x1xf32>
    %cst_4 = arith.constant 9.99999997E-7 : f32
    %8 = vector.broadcast %cst_4 : f32 to vector<16x1xf32>
    %9 = arith.addf %7, %8 : vector<16x1xf32>
    %10 = tpu.reciprocal %9 {approx = true} : vector<16x1xf32> -> vector<16x1xf32>
    %11 = vector.broadcast %10 : vector<16x1xf32> to vector<16x32xf32>
    %12 = arith.mulf %0, %11 : vector<16x32xf32>
    %13 = vector.broadcast %1 : vector<1x32xf32> to vector<16x32xf32>
    %14 = arith.mulf %12, %13 : vector<16x32xf32>
    %c0_5 = arith.constant 0 : index
    %c0_6 = arith.constant 0 : index
    %15 = vector.load %arg3[%c0_5, %c0_6] : memref<16x32xf32, #tpu.memory_space<vmem>>, vector<16x32xf32>
    tpu.vector_store %arg3[%c0_5, %c0_6], %14 {strides = array<i32>} : memref<16x32xf32, #tpu.memory_space<vmem>>, vector<16x32xf32>,
    return
  }
  func.func @transform_0(%arg0: i32) -> (i32, i32) {
    %c0_i32 = arith.constant 0 : i32
    %c0_i32_0 = arith.constant 0 : i32
    return %arg0, %c0_i32 : i32, i32
  }
  func.func @transform_1(%arg0: i32) -> (i32, i32) {
    %c0_i32 = arith.constant 0 : i32
    %c0_i32_0 = arith.constant 0 : i32
    %c0_i32_1 = arith.constant 0 : i32
    return %c0_i32, %c0_i32_0 : i32, i32
  }
  func.func @transform_2(%arg0: i32) -> (i32, i32) {
    %c0_i32 = arith.constant 0 : i32
    %c0_i32_0 = arith.constant 0 : i32
    return %arg0, %c0_i32 : i32, i32
  }
}

</mosaic_0001>

<bundles_post_ra>
// kernel: tpu_custom_call.1
= control target key start
LH: loop header
LB: loop body
LE: loop exit
PB: predicated region body
PF: predicated region fallthrough
CT: control target
= control target key end

     0   :  { %7 = vsyncpa [#allocation3], 0  ;;  %s183_s0 = inlined_call_operand.hbm [shape: f32[16,32], index: 0, kind: input, shape index: {}]   ;;  %s184_s1 = inlined_call_operand.vmem [shape: f32[1,32], index: 1, kind: input, shape index: {}]   ;;  %s185_s2 = inlined_call_operand.hbm [shape: f32[16,32], index: 2, kind: output, shape index: {}]  }
   0x1   :  { %8 = vsyncpa [#allocation4], 0  ;;  %s145_s9 = smov [#allocation2]  }
   0x2   :  { %s14_s10 = sshll.u32 %s145_s9, 4  ;;  %s15_s10 = int_to_ptr.vmem [resolvable:$true] %s14_s10 }
   0x3   :  { %s109_s11 = scalar_lea.vmem %s15_s10, 256  ;;  %p114_p1 = scmp.lt.s32.totalorder %s15_s10, %s15_s10 }
   0x4   :  { %p110_p0 = scmp.ne.s32.totalorder %s15_s10, %s109_s11  ;;  %p115_p2 = scmp.lt.s32.totalorder %s109_s11, %s109_s11 }
   0x6   :  { %p116_p3 = por %p115_p2, %p114_p1 }
   0x8   :  { %p117_p4 = pnand %p116_p3, %p110_p0 }
   0xa   :  { %120 = shalt.err (!%p117_p4)
}
   0xb   :  { %s146_s12 = smov 128   ;;  %s147_s13 = smov 8  }
   0xc   :  { %20 = dma.hbm_to_vmem [thread:$0]  %s183_s0, 256, %s15_s10, [#allocation3], %s146_s12, %s146_s12, %s147_s13  }
   0xd   :  { %141 = dma.done.wait [#allocation3], 256  }
   0xe   :  { %142 = vsyncadd [#allocation3], 4294967040  ;;  %v26_v0 = vld [vmem:[#allocation2] sm:$0xff]  ;;  %vm31_vm0 = vcmask 261120   ;;  %v27_v1 = vld [vmem:[#allocation2 + $0x8] sm:$0xff]  ;;  %s148_s17 = smov [#allocation5]  }
   0xf   :  { %v29_v2 = vmul.f32 %v26_v0, %v26_v0  ;;  %v30_v3 = vmul.f32 %v27_v1, %v27_v1  ;;  %v88_v23 = vld [vmem:[%s184_s1] ss:$0 sm:$0xff]  ;;  %s76_s18 = sshll.u32 %s148_s17, 4  ;;  %s77_s18 = int_to_ptr.vmem [resolvable:$true] %s76_s18 }
  0x10   :  { %s121_s19 = scalar_lea.vmem %s77_s18, 256  ;;  %p126_p6 = scmp.lt.s32.totalorder %s77_s18, %s77_s18 }
  0x11   :  { %v32_v4 = vsel %vm31_vm0, %v29_v2, 0.0  ;;  %v35_v5 = vsel %vm31_vm0, %v30_v3, 0.0  ;;  %p122_p5 = scmp.ne.s32.totalorder %s77_s18, %s121_s19  ;;  %p127_p7 = scmp.lt.s32.totalorder %s121_s19, %s121_s19 }
  0x12   :  { %33 = vadd.xlane.f32.xlu0 %v32_v4 }
  0x13   :  { %p128_p8 = por %p127_p7, %p126_p6 }
  0x15   :  { %p129_p9 = pnand %p128_p8, %p122_p5 }
  0x16   :  { %36 = vadd.xlane.f32.xlu0 %v35_v5 }
  0x9b   :  { %v34_v6 = vpop.xlane.xlu0 %33 }
  0x9c   :  { %v39_v7 = vmul.f32 0.03125, %v34_v6 }
  0x9e   :  { %93 = vrsqrt.f32 %v39_v7  ;;  %vm43_vm1 = vcmp.eq.f32.partialorder %v39_v7, inf  ;;  %v46_v12 = vand.u32 2147483648, %v39_v7  ;;  %vm45_vm2 = vcmp.eq.f32.partialorder %v39_v7, 0.0 }
  0x9f   :  { %v37_v8 = vpop.xlane.xlu0 %36 }
  0xa0   :  { %v40_v9 = vmul.f32 0.03125, %v37_v8 }
  0xa2   :  { %95 = vrsqrt.f32 %v40_v9  ;;  %vm50_vm3 = vcmp.eq.f32.partialorder %v40_v9, inf  ;;  %v53_v18 = vand.u32 2147483648, %v40_v9  ;;  %vm52_vm4 = vcmp.eq.f32.partialorder %v40_v9, 0.0 }
  0xab   :  { %v94_v10 = vpop.eup %93 }
  0xac   :  { %v42_v11 = vmul.f32 %v94_v10, %v39_v7 }
  0xae   :  { %v44_v13 = vsel %vm43_vm1, %v39_v7, %v42_v11 }
  0xaf   :  { %v96_v14 = vpop.eup %95  ;;  %v47_v15 = vsel %vm45_vm2, %v46_v12, %v44_v13 }
  0xb0   :  { %v55_v16 = vadd.f32 1e-06, %v47_v15  ;;  %v49_v17 = vmul.f32 %v96_v14, %v40_v9 }
  0xb2   :  { %97 = vrcp.f32 %v55_v16  ;;  %v51_v19 = vsel %vm50_vm3, %v40_v9, %v49_v17 }
  0xb3   :  { %v54_v20 = vsel %vm52_vm4, %v53_v18, %v51_v19 }
  0xb4   :  { %v56_v21 = vadd.f32 1e-06, %v54_v20 }
  0xb6   :  { %99 = vrcp.f32 %v56_v21 }
  0xbf   :  { %v98_v22 = vpop.eup %97 }
  0xc0   :  { %v59_v24 = vmul.f32 %v98_v22, %v26_v0 }
  0xc2   :  { %v67_v25 = vmul.f32 %v88_v23, %v59_v24 }
  0xc3   :  { %v100_v26 = vpop.eup %99 }
  0xc4   :  { %v60_v27 = vmul.f32 %v100_v26, %v27_v1  ;;  %69 = vst.msk [vmem:[#allocation5] sm:$0xff] %vm31_vm0, %v67_v25 }
  0xc6   :  { %v68_v28 = vmul.f32 %v88_v23, %v60_v27 }
  0xc8   :  { %70 = vst.msk [vmem:[#allocation5 + $0x8] sm:$0xff] %vm31_vm0, %v68_v28 }
  0xc9   :  { %132 = shalt.err (!%p129_p9)
}
  0xca   :  { %82 = dma.vmem_to_hbm [thread:$0]  %s77_s18, 256, %s185_s2, [#allocation4], %s146_s12, %s146_s12, %s147_s13  }
  0xcb   :  { %143 = dma.done.wait [#allocation4], 256  }
  0xcc   :  { %144 = vsyncadd [#allocation4], 4294967040 }
  0xcd   :  { %86 = vsyncpa [#allocation3], 1 }
  0xce   :  { %87 = vsyncpa [#allocation4], 1 }

</bundles_post_ra>
